<compile_context>
chip_gen: v7x
topology: tpu7x:2x2x1
jax: 0.10.0
libtpu: 0.0.40
codegen_flags: <defaults>
</compile_context>

<pallas_src>
import functools

import jax
import jax.numpy as jnp
from jax import lax
from jax.experimental import pallas as pl
from jax.experimental.pallas import tpu as pltpu

# Module constants (from the PyTorch source).
BLOCK_SIZE = 256          # max sequence length of the causal buffer (tril)
DROPOUT_P = 0.2
N_EMBD = 384


# --------------------------------------------------------------------------- #
# Device-generation helpers (best effort; safe fallbacks).
# --------------------------------------------------------------------------- #
def _device_kind():
    try:
        return jax.devices()[0].device_kind.lower()
    except Exception:
        return ""


def _is_v7x(kind):
    return "7" in kind


def _use_bf16_exp(kind):
    # v6e / v7x have a bf16 EUP path; v5e and older do not -> keep f32 there.
    if not kind:
        return False
    for old in ("v2", "v3", "v4", "v5"):
        if old in kind:
            return False
    return True


# --------------------------------------------------------------------------- #
# Dropout mask: portable counter-based hash PRNG (murmur3-style mixing).
# Pure uint32 ops -> lowers on TPU Mosaic and in interpret mode alike.
# TODO(synk): not bit-identical to torch's RNG stream; keep-prob and 1/(1-p)
# scaling semantics match nn.Dropout.
# --------------------------------------------------------------------------- #
def _dropout_keep_mask(bt, T, seed, block_id, p_drop):
    r = lax.broadcasted_iota(jnp.int32, (bt * T, T), 0).astype(jnp.uint32)
    c = lax.broadcasted_iota(jnp.int32, (bt * T, T), 1).astype(jnp.uint32)

    seed_u = seed.astype(jnp.uint32)
    bid_u = block_id.astype(jnp.uint32)

    h = (seed_u * jnp.uint32(0x9E3779B1)) ^ (bid_u * jnp.uint32(0x85EBCA77))
    h = h ^ (r * jnp.uint32(0xC2B2AE3D))
    h = h ^ (c * jnp.uint32(0x27D4EB2F))
    # murmur3 fmix32
    h = h ^ (h >> jnp.uint32(16))
    h = h * jnp.uint32(0x85EBCA6B)
    h = h ^ (h >> jnp.uint32(13))
    h = h * jnp.uint32(0xC2B2AE35)
    h = h ^ (h >> jnp.uint32(16))

    # Direct uint32 compare: keep with prob (1 - p_drop). No float convert.
    thresh = jnp.uint32(int(round(p_drop * float(1 << 32))) & 0xFFFFFFFF)
    keep = h >= thresh
    return keep.reshape(bt, T, T)


# --------------------------------------------------------------------------- #
# Kernel: one batch block (bt elements) per grid step.
# --------------------------------------------------------------------------- #
def _head_kernel(seed_ref, x_ref, wqkv_ref, o_ref, *,
                 p_drop, training, head_size, head_pad, exp_dtype):
    """
    x_ref    : (bt, T, C)        VMEM, bf16
    wqkv_ref : (C, 3*head_pad)   VMEM, bf16  [q*scale | 0 | k | 0 | v | 0]
    o_ref    : (bt, T, H)        VMEM, f32
    seed_ref : (1,) int32        SMEM (scalar prefetch) -- dropout seed
    """
    bt, T, C = x_ref.shape
    H = head_size
    HP = head_pad

    # ---- fused q/k/v projection: one bf16 MXU matmul, N = 3*HP -------------
    x2d = x_ref[...].reshape(bt * T, C)                               # bf16
    w = wqkv_ref[...]                                                 # bf16
    qkv = jnp.dot(x2d, w, preferred_element_type=jnp.float32)         # (bt*T, 3HP) f32

    # 128-lane-aligned, whole-vreg column slices (zero-padded per head).
    q = qkv[:, 0 * HP:1 * HP].reshape(bt, T, HP).astype(jnp.bfloat16)
    k = qkv[:, 1 * HP:2 * HP].reshape(bt, T, HP).astype(jnp.bfloat16)
    v = qkv[:, 2 * HP:3 * HP].reshape(bt, T, HP).astype(jnp.bfloat16)

    # ---- attention logits: batched NT contraction (no k transpose) ---------
    # NOTE: the n_embd**-0.5 scale (the PyTorch source uses C = n_embd, not
    # head_size) is folded into the query weight columns in the wrapper.
    # Zero-padded columns of q/k contribute nothing -> exact.
    s = jnp.einsum('bqh,bkh->bqk', q, k,
                   preferred_element_type=jnp.float32)                # (bt,T,T) f32

    # ---- causal mask (built once per grid step, broadcast over bt) ---------
    row = lax.broadcasted_iota(jnp.int32, (T, T), 0)
    col = lax.broadcasted_iota(jnp.int32, (T, T), 1)
    s = jnp.where((col <= row)[None, :, :], s, -jnp.inf)

    # ---- numerically-stable softmax over keys -------------------------------
    m = jnp.max(s, axis=-1, keepdims=True)
    p = jnp.exp((s - m).astype(exp_dtype)).astype(jnp.float32)        # EUP
    denom = jnp.sum(p, axis=-1, keepdims=True)

    if training:
        # nn.Dropout on the attention weights: zero with prob p, scale
        # survivors 1/(1-p).  The survivor scale is folded into the reciprocal.
        inv = pl.reciprocal(denom * jnp.float32(1.0 - p_drop), approx=True)
        keep = _dropout_keep_mask(bt, T, seed_ref[0], pl.program_id(0), p_drop)
        probs = jnp.where(keep, p * inv, 0.0)
    else:
        probs = p * pl.reciprocal(denom, approx=True)

    # ---- weighted sum of values (bf16 MXU, f32 accumulate) -----------------
    out = jnp.einsum('bqk,bkh->bqh', probs.astype(jnp.bfloat16), v,
                     preferred_element_type=jnp.float32)              # (bt,T,HP)
    o_ref[...] = out[..., :H].astype(o_ref.dtype)


# --------------------------------------------------------------------------- #
# Wrapper
# --------------------------------------------------------------------------- #
def head_forward(x, w_key, w_query, w_value, *, training=False, seed=0,
                 batch_block=None):
    """Single-head causal self attention.

    x          : (B, T, C) float32
    w_key/q/v  : (head_size, C)  -- PyTorch nn.Linear weight layout (out, in)
    returns    : (B, T, head_size) float32
    """
    B, T, C = x.shape
    H = w_key.shape[0]
    assert T <= BLOCK_SIZE, "sequence length exceeds causal buffer"

    kind = _device_kind()
    exp_dtype = jnp.bfloat16 if _use_bf16_exp(kind) else jnp.float32

    # Per-head padded width: round head_size up to a full 128-lane vreg group
    # so that q/k/v column slices of the fused projection are vreg-aligned.
    HP = ((H + 127) // 128) * 128

    scale = float(C) ** (-0.5)

    def pad_cols(w_t):  # (C, H) -> (C, HP), zero columns on the right
        if HP == H:
            return w_t
        return jnp.pad(w_t, ((0, 0), (0, HP - H)))

    # Fused, pre-transposed, pre-scaled, pre-cast QKV weight: (C, 3*HP) bf16.
    w_qkv = jnp.concatenate([
        pad_cols(w_query.T * jnp.float32(scale)),   # C**-0.5 folded into Wq
        pad_cols(w_key.T),
        pad_cols(w_value.T),
    ], axis=1).astype(jnp.bfloat16)

    # bf16 activation stream (operands are bf16 in the MXU anyway).
    x_bf16 = x.astype(jnp.bfloat16)

    # ---- batch block selection (generation aware) ---------------------------
    if batch_block is None:
        candidates = (8, 4, 2, 1) if _is_v7x(kind) else (16, 8, 4, 2, 1)
        bt = 1
        for cand in candidates:
            if B % cand == 0:
                bt = cand
                break
        if _is_v7x(kind):
            # Prefer an even grid length >= 2 for the two TensorCores.
            while bt > 1 and (B // bt) % 2 != 0:
                bt //= 2
    else:
        bt = batch_block
    assert B % bt == 0, "batch must be divisible by the batch block"

    # ---- VMEM budget (raise the scoped default when the block is large) -----
    def _vmem_limit_bytes():
        streamed = 2 * (bt * T * C * 2 + C * 3 * HP * 2 + bt * T * H * 4)
        transients = (bt * T * 3 * HP * 4          # qkv f32
                      + 3 * bt * T * HP * 2        # q/k/v bf16
                      + 2 * bt * T * T * 4         # logits + exp f32
                      + bt * T * T * 2             # probs bf16
                      + bt * T * HP * 4)           # out f32
        need = 2 * (streamed + transients) + (2 << 20)
        if need <= 16 * 1024 * 1024:
            return None                            # within every scoped default
        cap = (56 if _is_v7x(kind) else 100) * 1024 * 1024
        return min(need, cap)

    vmem_limit = _vmem_limit_bytes()

    seed_arr = jnp.array([seed], dtype=jnp.int32)

    kernel = functools.partial(
        _head_kernel, p_drop=DROPOUT_P, training=training,
        head_size=H, head_pad=HP, exp_dtype=exp_dtype)

    grid_spec = pltpu.PrefetchScalarGridSpec(
        num_scalar_prefetch=1,
        grid=(B // bt,),
        in_specs=[
            pl.BlockSpec((bt, T, C), lambda b, seed: (b, 0, 0)),     # x block
            pl.BlockSpec((C, 3 * HP), lambda b, seed: (0, 0)),       # fused Wqkv
        ],
        out_specs=pl.BlockSpec((bt, T, H), lambda b, seed: (b, 0, 0)),
    )

    return pl.pallas_call(
        kernel,
        out_shape=jax.ShapeDtypeStruct((B, T, H), jnp.float32),
        grid_spec=grid_spec,
        compiler_params=pltpu.CompilerParams(
            dimension_semantics=("parallel",),
            vmem_limit_bytes=vmem_limit),
    )(seed_arr, x_bf16, w_qkv)


def head_reference(x, w_key, w_query, w_value):
    """Pure-JAX f32 reference (eval mode, dropout = identity)."""
    B, T, C = x.shape
    k = x @ w_key.T
    q = x @ w_query.T
    v = x @ w_value.T
    wei = (q @ jnp.swapaxes(k, -2, -1)) * (C ** -0.5)
    mask = jnp.tril(jnp.ones((T, T), dtype=bool))
    wei = jnp.where(mask[None, :, :], wei, -jnp.inf)
    wei = jax.nn.softmax(wei, axis=-1)
    return wei @ v


if __name__ == "__main__":
    # Small, deterministic example shapes consistent with the module:
    # batch=2, seq=8, n_embd=384 (module constant), head_size=64.
    B, T, C, H = 2, 8, N_EMBD, 64

    key = jax.random.PRNGKey(0)
    kx, kk, kq, kv = jax.random.split(key, 4)

    x = jax.random.normal(kx, (B, T, C), dtype=jnp.float32)

    # nn.Linear(n_embd, head_size, bias=False) default init:
    # U(-1/sqrt(C), 1/sqrt(C)), weight shape (head_size, n_embd).
    bound = 1.0 / (C ** 0.5)
    w_key = jax.random.uniform(kk, (H, C), minval=-bound, maxval=bound,
                               dtype=jnp.float32)
    w_query = jax.random.uniform(kq, (H, C), minval=-bound, maxval=bound,
                                 dtype=jnp.float32)
    w_value = jax.random.uniform(kv, (H, C), minval=-bound, maxval=bound,
                                 dtype=jnp.float32)

    # Eval-mode forward (dropout = identity) so the result is deterministic.
    out = head_forward(x, w_key, w_query, w_value, training=False)
    out = jax.block_until_ready(out)

    ref = head_reference(x, w_key, w_query, w_value)
    assert out.shape == (B, T, H)
    # Kernel uses bf16 MXU operands (incl. bf16 x) with f32 accumulation ->
    # compare against the f32 reference with a bf16-appropriate tolerance.
    assert jnp.allclose(out, ref, atol=3e-2, rtol=3e-2), "mismatch vs reference"

    # Training-mode smoke test (portable hash dropout; no TPU-only PRNG).
    out_tr = jax.block_until_ready(
        head_forward(x, w_key, w_query, w_value, training=True, seed=123))
    assert out_tr.shape == (B, T, H)
    assert bool(jnp.all(jnp.isfinite(out_tr)))

    print("KERNEL_OK")
</pallas_src>

<mosaic_0001>
module attributes {stable_mosaic.version = 11 : i64} {
  func.func @_head_kernel(%arg0: i32, %arg1: memref<1xi32, #tpu.memory_space<smem>>, %arg2: memref<2x8x384xbf16, #tpu.memory_space<vmem>>, %arg3: memref<384x384xbf16, #tpu.memory_space<vmem>>, %arg4: memref<2x8x64xf32, #tpu.memory_space<vmem>>) attributes {dimension_semantics = [#tpu.dimension_semantics<parallel>], iteration_bounds = array<i64: 1>, scalar_prefetch = 1 : i64, scratch_operands = 0 : i64, tpu.core_type = #tpu.core_type<tc>, window_params = [{transform_indices = @transform_0, window_bounds = array<i64: 2, 8, 384>}, {pipeline_mode = #tpu.pipeline_mode<synchronous>, transform_indices = @transform_1, window_bounds = array<i64: 384, 384>}, {transform_indices = @transform_2, window_bounds = array<i64: 2, 8, 64>}]} {
    %c0 = arith.constant 0 : index
    %c0_0 = arith.constant 0 : index
    %c0_1 = arith.constant 0 : index
    %0 = vector.load %arg2[%c0, %c0_0, %c0_1] : memref<2x8x384xbf16, #tpu.memory_space<vmem>>, vector<2x8x384xbf16>
    %1 = vector.shape_cast %0 : vector<2x8x384xbf16> to vector<16x384xbf16>
    %c0_2 = arith.constant 0 : index
    %c0_3 = arith.constant 0 : index
    %2 = vector.load %arg3[%c0_2, %c0_3] : memref<384x384xbf16, #tpu.memory_space<vmem>>, vector<384x384xbf16>
    %cst = arith.constant dense<0.000000e+00> : vector<16x384xf32>
    %3 = tpu.matmul %1, %2, %cst {dimension_numbers = #tpu.dot_dimension_numbers<[1], [0], [0], [1], [0, 0, 1, 1], [], []>} : vector<16x384xbf16>, vector<384x384xbf16>, vector<16x384xf32> -> vector<16x384xf32>
    %4 = vector.extract_strided_slice %3 {offsets = [0, 0], sizes = [16, 128], strides = [1, 1]} : vector<16x384xf32> to vector<16x128xf32>
    %5 = vector.shape_cast %4 : vector<16x128xf32> to vector<2x8x128xf32>
    %6 = arith.truncf %5 : vector<2x8x128xf32> to vector<2x8x128xbf16>
    %7 = vector.extract_strided_slice %3 {offsets = [0, 128], sizes = [16, 128], strides = [1, 1]} : vector<16x384xf32> to vector<16x128xf32>
    %8 = vector.shape_cast %7 : vector<16x128xf32> to vector<2x8x128xf32>
    %9 = arith.truncf %8 : vector<2x8x128xf32> to vector<2x8x128xbf16>
    %10 = vector.extract_strided_slice %3 {offsets = [0, 256], sizes = [16, 128], strides = [1, 1]} : vector<16x384xf32> to vector<16x128xf32>
    %11 = vector.shape_cast %10 : vector<16x128xf32> to vector<2x8x128xf32>
    %12 = arith.truncf %11 : vector<2x8x128xf32> to vector<2x8x128xbf16>
    "tpu.trace_start"() <{level = 10 : i32, message = "bqh,bkh->bqk"}> : () -> ()
    %cst_4 = arith.constant dense<0.000000e+00> : vector<2x8x8xf32>
    %13 = tpu.matmul %6, %9, %cst_4 {dimension_numbers = #tpu.dot_dimension_numbers<[2], [2], [1], [1], [0, 0, 0, 1, 1, 1], [0], [0]>} : vector<2x8x128xbf16>, vector<2x8x128xbf16>, vector<2x8x8xf32> -> vector<2x8x8xf32>
    "tpu.trace_stop"() : () -> ()
    %14 = tpu.iota {dimensions = array<i32: 0>} : vector<8x8xi32>
    %15 = tpu.iota {dimensions = array<i32: 1>} : vector<8x8xi32>
    %16 = arith.cmpi sle, %15, %14 : vector<8x8xi32>
    %17 = vector.shape_cast %16 : vector<8x8xi1> to vector<1x8x8xi1>
    %cst_5 = arith.constant 0xFF800000 : f32
    %18 = vector.shape_cast %17 : vector<1x8x8xi1> to vector<1x8x8xi1>
    %19 = vector.broadcast %18 : vector<1x8x8xi1> to vector<2x8x8xi1>
    %20 = vector.broadcast %cst_5 : f32 to vector<2x8x8xf32>
    %21 = arith.select %19, %13, %20 : vector<2x8x8xi1>, vector<2x8x8xf32>
    %cst_6 = arith.constant dense<0xFF800000> : vector<2x8xf32>
    %22 = vector.multi_reduction <maximumf>, %21, %cst_6 [2] : vector<2x8x8xf32> to vector<2x8xf32>
    %23 = vector.shape_cast %22 : vector<2x8xf32> to vector<2x8x1xf32>
    %24 = vector.broadcast %23 : vector<2x8x1xf32> to vector<2x8x8xf32>
    %25 = arith.subf %21, %24 : vector<2x8x8xf32>
    %26 = arith.truncf %25 : vector<2x8x8xf32> to vector<2x8x8xbf16>
    %27 = math.exp %26 : vector<2x8x8xbf16>
    %28 = arith.extf %27 : vector<2x8x8xbf16> to vector<2x8x8xf32>
    %cst_7 = arith.constant dense<0.000000e+00> : vector<2x8xf32>
    %29 = vector.multi_reduction <add>, %28, %cst_7 [2] : vector<2x8x8xf32> to vector<2x8xf32>
    %30 = vector.shape_cast %29 : vector<2x8xf32> to vector<2x8x1xf32>
    %31 = tpu.reciprocal %30 {approx = true} : vector<2x8x1xf32> -> vector<2x8x1xf32>
    %32 = vector.broadcast %31 : vector<2x8x1xf32> to vector<2x8x8xf32>
    %33 = arith.mulf %28, %32 : vector<2x8x8xf32>
    %34 = arith.truncf %33 : vector<2x8x8xf32> to vector<2x8x8xbf16>
    "tpu.trace_start"() <{level = 10 : i32, message = "bqk,bkh->bqh"}> : () -> ()
    %cst_8 = arith.constant dense<0.000000e+00> : vector<2x8x128xf32>
    %35 = tpu.matmul %34, %12, %cst_8 {dimension_numbers = #tpu.dot_dimension_numbers<[2], [1], [1], [2], [0, 0, 0, 1, 1, 2], [0], [0]>} : vector<2x8x8xbf16>, vector<2x8x128xbf16>, vector<2x8x128xf32> -> vector<2x8x128xf32>
    "tpu.trace_stop"() : () -> ()
    %36 = vector.extract_strided_slice %35 {offsets = [0, 0, 0], sizes = [2, 8, 64], strides = [1, 1, 1]} : vector<2x8x128xf32> to vector<2x8x64xf32>
    %c0_9 = arith.constant 0 : index
    %c0_10 = arith.constant 0 : index
    %c0_11 = arith.constant 0 : index
    %37 = vector.load %arg4[%c0_9, %c0_10, %c0_11] : memref<2x8x64xf32, #tpu.memory_space<vmem>>, vector<2x8x64xf32>
    tpu.vector_store %arg4[%c0_9, %c0_10, %c0_11], %36 {strides = array<i32>} : memref<2x8x64xf32, #tpu.memory_space<vmem>>, vector<2x8x64xf32>,
    return
  }
  func.func @transform_0(%arg0: i32, %arg1: memref<1xi32, #tpu.memory_space<smem>>) -> (i32, i32, i32) {
    %c0_i32 = arith.constant 0 : i32
    %c0_i32_0 = arith.constant 0 : i32
    %c0_i32_1 = arith.constant 0 : i32
    return %arg0, %c0_i32, %c0_i32_0 : i32, i32, i32
  }
  func.func @transform_1(%arg0: i32, %arg1: memref<1xi32, #tpu.memory_space<smem>>) -> (i32, i32) {
    %c0_i32 = arith.constant 0 : i32
    %c0_i32_0 = arith.constant 0 : i32
    %c0_i32_1 = arith.constant 0 : i32
    return %c0_i32, %c0_i32_0 : i32, i32
  }
  func.func @transform_2(%arg0: i32, %arg1: memref<1xi32, #tpu.memory_space<smem>>) -> (i32, i32, i32) {
    %c0_i32 = arith.constant 0 : i32
    %c0_i32_0 = arith.constant 0 : i32
    %c0_i32_1 = arith.constant 0 : i32
    return %arg0, %c0_i32, %c0_i32_0 : i32, i32, i32
  }
}

</mosaic_0001>

<bundles_post_ra>
// kernel: tpu_custom_call.1
= control target key start
LH: loop header
LB: loop body
LE: loop exit
PB: predicated region body
PF: predicated region fallthrough
CT: control target
= control target key end

     0   :  { %9 = vsyncpa [#allocation5], 0  ;;  %s1399_s0 = inlined_call_operand.<no memory space> [shape: s32[1], index: 0, kind: input, shape index: {}]   ;;  %s1400_s1 = inlined_call_operand.hbm [shape: bf16[2,8,384], index: 1, kind: input, shape index: {}]   ;;  %s1401_s2 = inlined_call_operand.hbm [shape: bf16[384,384], index: 2, kind: input, shape index: {}]   ;;  %s1402_s3 = inlined_call_operand.hbm [shape: f32[2,8,64], index: 3, kind: output, shape index: {}]  }
   0x1   :  { %10 = vsyncpa [#allocation8], 0 }
   0x2   :  { %11 = vsyncpa [#allocation6], 0  ;;  %s1305_s12 = smov [#allocation4]   ;;  %s1233_s16 = scalar_lea.hbm %s1400_s1, 384 }
   0x3   :  { %s17_s13 = sshll.u32 %s1305_s12, 4  ;;  %p1234_p0 = scmp.ne.s32.totalorder %s1400_s1, %s1233_s16  ;;  %s18_s13 = int_to_ptr.vmem [resolvable:$true] %s17_s13 }
   0x4   :  { %p1237_p1 = scmp.lt.u32.totalorder %s1233_s16, %s1400_s1 }
   0x6   :  { %p1239_p2 = pnand %p1237_p1, %p1234_p0 }
   0x8   :  { %1242 = shalt.err (!%p1239_p2)
}
   0x9   :  { %s1243_s20 = scalar_lea.vmem %s18_s13, 384  ;;  %p1248_p4 = scmp.lt.s32.totalorder %s18_s13, %s18_s13 }
   0xa   :  { %p1244_p3 = scmp.ne.s32.totalorder %s18_s13, %s1243_s20  ;;  %p1249_p5 = scmp.lt.s32.totalorder %s1243_s20, %s1243_s20 }
   0xc   :  { %p1250_p6 = por %p1249_p5, %p1248_p4 }
   0xe   :  { %p1251_p7 = pnand %p1250_p6, %p1244_p3 }
  0x10   :  { %1254 = shalt.err (!%p1251_p7)
}
  0x11   :  { %s1306_s21 = smov 192   ;;  %s1307_s22 = smov 12  }
  0x12   :  { %23 = dma.hbm_to_vmem [thread:$0]  %s1400_s1, 384, %s18_s13, [#allocation5], %s1306_s21, %s1306_s21, %s1307_s22  }
  0x13   :  { %s1308_s25 = smov [#allocation7]   ;;  %s1255_s29 = scalar_lea.hbm %s1401_s2, 9216 }
  0x14   :  { %s29_s26 = sshll.u32 %s1308_s25, 4  ;;  %p1256_p8 = scmp.ne.s32.totalorder %s1401_s2, %s1255_s29  ;;  %s30_s26 = int_to_ptr.vmem [resolvable:$true] %s29_s26 }
  0x15   :  { %p1259_p9 = scmp.lt.u32.totalorder %s1255_s29, %s1401_s2 }
  0x17   :  { %p1261_p10 = pnand %p1259_p9, %p1256_p8 }
  0x19   :  { %1264 = shalt.err (!%p1261_p10)
}
  0x1a   :  { %s1265_s7 = scalar_lea.vmem %s30_s26, 9216  ;;  %p1270_p12 = scmp.lt.s32.totalorder %s30_s26, %s30_s26 }
  0x1b   :  { %p1266_p11 = scmp.ne.s32.totalorder %s30_s26, %s1265_s7  ;;  %p1271_p13 = scmp.lt.s32.totalorder %s1265_s7, %s1265_s7 }
  0x1d   :  { %p1272_p0 = por %p1271_p13, %p1270_p12 }
  0x1f   :  { %p1273_p1 = pnand %p1272_p0, %p1266_p11 }
  0x21   :  { %1276 = shalt.err (!%p1273_p1)
}
  0x22   :  { %35 = dma.hbm_to_vmem [thread:$0]  %s1401_s2, 9216, %s30_s26, [#allocation8], %s1306_s21, %s1306_s21, %s1307_s22  }
  0x23   :  { %1299 = dma.done.wait [#allocation5], 384  }
  0x24   :  { %1300 = vsyncadd [#allocation5], 4294966912 }
  0x25   :  { %1301 = dma.done.wait [#allocation8], 9216  }
  0x26   :  { %1302 = vsyncadd [#allocation8], 4294958080  ;;  %v1125_v0 = vld [vmem:[#allocation7 + $0x4] ss:$12 sps:$4 sm:$0xff]   ;;  %v1127_v1 = vld [vmem:[#allocation7] ss:$12 sps:$4 sm:$0xff]  }
  0x27   :  { %543 = vmatprep.subr.bf16.mxu0 %v1125_v0  ;;  %v1128_v2 = vld [vmem:[#allocation7 + $0x1c] ss:$12 sps:$4 sm:$0xff]   ;;  %v1130_v3 = vld [vmem:[#allocation7 + $0x18] ss:$12 sps:$4 sm:$0xff]   ;;  %v1131_v4 = vld [vmem:[#allocation7 + $0x34] ss:$12 sps:$4 sm:$0xff]  }
  0x28   :  { %544 = vmatpush1.bf16.msra.mxu0 %v1127_v1  ;;  %v1133_v5 = vld [vmem:[#allocation7 + $0x30] ss:$12 sps:$4 sm:$0xff]   ;;  %v1134_v6 = vld [vmem:[#allocation7 + $0x4c] ss:$12 sps:$4 sm:$0xff]   ;;  %v1136_v7 = vld [vmem:[#allocation7 + $0x48] ss:$12 sps:$4 sm:$0xff]  }
  0x29   :  { %545 = vmatprep.subr.bf16.mxu0 %v1128_v2  ;;  %v1137_v8 = vld [vmem:[#allocation7 + $0x64] ss:$12 sps:$4 sm:$0xff]   ;;  %v1139_v9 = vld [vmem:[#allocation7 + $0x60] ss:$12 sps:$4 sm:$0xff]   ;;  %v1140_v10 = vld [vmem:[#allocation7 + $0x7c] ss:$12 sps:$4 sm:$0xff]  }
  0x2a   :  { %v1142_v11 = vld [vmem:[#allocation7 + $0x78] ss:$12 sps:$4 sm:$0xff]   ;;  %v1143_v12 = vld [vmem:[#allocation7 + $0x94] ss:$12 sps:$4 sm:$0xff]   ;;  %v1145_v14 = vld [vmem:[#allocation7 + $0x90] ss:$12 sps:$4 sm:$0xff]  }
  0x2b   :  { %v1175_v13 = vld [vmem:[#allocation4 + $0x4] ss:$12 sps:$4 sm:$0xff]   ;;  %v1148_v16 = vld [vmem:[#allocation7 + $0xa8] ss:$12 sps:$4 sm:$0xff]   ;;  %v1149_v17 = vld [vmem:[#allocation7 + $0xc4] ss:$12 sps:$4 sm:$0xff]  }
  0x2c   :  { %546 = vmatpush1.bf16.msra.mxu0 %v1130_v3  ;;  %v1146_v15 = vld [vmem:[#allocation7 + $0xac] ss:$12 sps:$4 sm:$0xff]   ;;  %575 = vmatprep.mubr.bf16.mxu0 %v1175_v13  ;;  %v1152_v19 = vld [vmem:[#allocation7 + $0xdc] ss:$12 sps:$4 sm:$0xff]   ;;  %v1155_v21 = vld [vmem:[#allocation7 + $0xf4] ss:$12 sps:$4 sm:$0xff]  }
  0x2d   :  { %547 = vmatprep.subr.bf16.mxu0 %v1131_v4  ;;  %661 = vmatprep.mubr.bf16.mxu1 %v1175_v13  ;;  %v1151_v18 = vld [vmem:[#allocation7 + $0xc0] ss:$12 sps:$4 sm:$0xff]   ;;  %v1154_v20 = vld [vmem:[#allocation7 + $0xd8] ss:$12 sps:$4 sm:$0xff]   ;;  %v1201_v22 = vld [vmem:[#allocation7 + $0xc8] ss:$12 sps:$4 sm:$0xff]  }
  0x2e   :  { %v1202_v23 = vld [vmem:[#allocation7 + $0x8] ss:$12 sps:$4 sm:$0xff]   ;;  %v1157_v24 = vld [vmem:[#allocation7 + $0xf0] ss:$12 sps:$4 sm:$0xff]   ;;  %1028 = vmatprep.subr.bf16.mxu1 %v1201_v22  ;;  %v1203_v25 = vld [vmem:[#allocation7 + $0xe0] ss:$12 sps:$4 sm:$0xff]  }
  0x2f   :  { %1029 = vmatpush3.bf16.msra.mxu1 %v1202_v23  ;;  %v1204_v26 = vld [vmem:[#allocation7 + $0x20] ss:$12 sps:$4 sm:$0xff]   ;;  %v1205_v27 = vld [vmem:[#allocation7 + $0xf8] ss:$12 sps:$4 sm:$0xff]   ;;  %v1160_v29 = vld [vmem:[#allocation7 + $0x108] ss:$12 sps:$4 sm:$0xff]  }
  0x30   :  { %548 = vmatpush1.bf16.msra.mxu0 %v1133_v5  ;;  %1030 = vmatprep.subr.bf16.mxu1 %v1203_v25  ;;  %v1158_v28 = vld [vmem:[#allocation7 + $0x10c] ss:$12 sps:$4 sm:$0xff]   ;;  %v1207_v31 = vld [vmem:[#allocation7 + $0x110] ss:$12 sps:$4 sm:$0xff]   ;;  %v1209_v35 = vld [vmem:[#allocation7 + $0x128] ss:$12 sps:$4 sm:$0xff]  }
  0x31   :  { %549 = vmatprep.subr.bf16.mxu0 %v1134_v6  ;;  %v1206_v30 = vld [vmem:[#allocation7 + $0x38] ss:$12 sps:$4 sm:$0xff]   ;;  %v1163_v33 = vld [vmem:[#allocation7 + $0x120] ss:$12 sps:$4 sm:$0xff]   ;;  %v1208_v34 = vld [vmem:[#allocation7 + $0x50] ss:$12 sps:$4 sm:$0xff]  }
  0x32   :  { %v1161_v32 = vld [vmem:[#allocation7 + $0x124] ss:$12 sps:$4 sm:$0xff]   ;;  %v1164_v36 = vld [vmem:[#allocation7 + $0x13c] ss:$12 sps:$4 sm:$0xff]   ;;  %v1211_v39 = vld [vmem:[#allocation7 + $0x140] ss:$12 sps:$4 sm:$0xff]  }
  0x33   :  { %1031 = vmatpush3.bf16.msra.mxu1 %v1204_v26  ;;  %v1166_v37 = vld [vmem:[#allocation7 + $0x138] ss:$12 sps:$4 sm:$0xff]   ;;  %v1210_v38 = vld [vmem:[#allocation7 + $0x68] ss:$12 sps:$4 sm:$0xff]   ;;  %v1169_v41 = vld [vmem:[#allocation7 + $0x150] ss:$12 sps:$4 sm:$0xff]  }
  0x34   :  { %550 = vmatpush1.bf16.msra.mxu0 %v1136_v7  ;;  %1032 = vmatprep.subr.bf16.mxu1 %v1205_v27  ;;  %v1167_v40 = vld [vmem:[#allocation7 + $0x154] ss:$12 sps:$4 sm:$0xff]   ;;  %v1213_v43 = vld [vmem:[#allocation7 + $0x158] ss:$12 sps:$4 sm:$0xff]   ;;  %v1215_v47 = vld [vmem:[#allocation7 + $0x170] ss:$12 sps:$4 sm:$0xff]  }
  0x35   :  { %551 = vmatprep.subr.bf16.mxu0 %v1137_v8  ;;  %v1212_v42 = vld [vmem:[#allocation7 + $0x80] ss:$12 sps:$4 sm:$0xff]   ;;  %v1214_v45 = vld [vmem:[#allocation7 + $0x98] ss:$12 sps:$4 sm:$0xff]   ;;  %v1172_v46 = vld [vmem:[#allocation7 + $0x168] ss:$12 sps:$4 sm:$0xff]  }
  0x36   :  { %v1170_v44 = vld [vmem:[#allocation7 + $0x16c] ss:$12 sps:$4 sm:$0xff]   ;;  %v1178_v48 = vld [vmem:[#allocation7 + $0x184] ss:$12 sps:$4 sm:$0xff]   ;;  %v1173_v49 = vld [vmem:[#allocation4] ss:$12 sps:$4 sm:$0xff]  }
  0x37   :  { %1033 = vmatpush3.bf16.msra.mxu1 %v1206_v30  ;;  %v1216_v50 = vld [vmem:[#allocation7 + $0xb0] ss:$12 sps:$4 sm:$0xff]   ;;  %v1176_v51 = vld [vmem:[#allocation7 + $0x180] ss:$12 sps:$4 sm:$0xff]   ;;  %v1217_v53 = vld [vmem:[#allocation7 + $0x188] ss:$12 sps:$4 sm:$0xff]  }
  0x38   :  { %552 = vmatpush1.bf16.msra.mxu0 %v1139_v9  ;;  %1034 = vmatprep.subr.bf16.mxu1 %v1207_v31  ;;  %v1181_v52 = vld [vmem:[#allocation7 + $0x19c] ss:$12 sps:$4 sm:$0xff]   ;;  %v1179_v54 = vld [vmem:[#allocation7 + $0x198] ss:$12 sps:$4 sm:$0xff]   ;;  %v1309_v55 = vmov 0   ;;  %v1310_v57 = vmov 0.0  }
  0x39   :  { %553 = vmatprep.subr.bf16.mxu0 %v1140_v10  ;;  %v1184_v56 = vld [vmem:[#allocation7 + $0x1b4] ss:$12 sps:$4 sm:$0xff]   ;;  %vm1311_vm0 = vmmov 0   ;;  %v1182_v59 = vld [vmem:[#allocation7 + $0x1b0] ss:$12 sps:$4 sm:$0xff]   ;;  %vm840_vm1 = vcmask 1043456  }
  0x3a   :  { %v1218_v58 = vld [vmem:[#allocation7 + $0x1a0] ss:$12 sps:$4 sm:$0xff]   ;;  %v1219_v61 = vld [vmem:[#allocation7 + $0x1b8] ss:$12 sps:$4 sm:$0xff]   ;;  %v1185_v62 = vld [vmem:[#allocation7 + $0x1c8] ss:$12 sps:$4 sm:$0xff]  }
  0x3b   :  { %1035 = vmatpush3.bf16.msra.mxu1 %v1208_v34  ;;  %v1187_v60 = vld [vmem:[#allocation7 + $0x1cc] ss:$12 sps:$4 sm:$0xff]   ;;  %v1190_v63 = vld [vmem:[#allocation7 + $0x1e4] ss:$12 sps:$4 sm:$0xff]   ;;  %v1193_v2 = vld [vmem:[#allocation7 + $0x1fc] ss:$12 sps:$4 sm:$0xff]  }
  0x3c   :  { %554 = vmatpush1.bf16.msra.mxu0 %v1142_v11  ;;  %1036 = vmatprep.subr.bf16.mxu1 %v1209_v35  ;;  %v1220_v0 = vld [vmem:[#allocation7 + $0x1d0] ss:$12 sps:$4 sm:$0xff]   ;;  %v1188_v1 = vld [vmem:[#allocation7 + $0x1e0] ss:$12 sps:$4 sm:$0xff]   ;;  %v1221_v3 = vld [vmem:[#allocation7 + $0x1e8] ss:$12 sps:$4 sm:$0xff]  }
  0x3d   :  { %555 = vmatprep.subr.bf16.mxu0 %v1143_v12  ;;  %v1191_v4 = vld [vmem:[#allocation7 + $0x1f8] ss:$12 sps:$4 sm:$0xff]   ;;  %v1196_v5 = vld [vmem:[#allocation7 + $0x214] ss:$12 sps:$4 sm:$0xff]   ;;  %v1194_v7 = vld [vmem:[#allocation7 + $0x210] ss:$12 sps:$4 sm:$0xff]  }
  0x3e   :  { %v1222_v6 = vld [vmem:[#allocation7 + $0x200] ss:$12 sps:$4 sm:$0xff]   ;;  %v1223_v9 = vld [vmem:[#allocation7 + $0x218] ss:$12 sps:$4 sm:$0xff]   ;;  %v1197_v10 = vld [vmem:[#allocation7 + $0x228] ss:$12 sps:$4 sm:$0xff]  }
  0x3f   :  { %1037 = vmatpush3.bf16.msra.mxu1 %v1210_v38  ;;  %v1199_v8 = vld [vmem:[#allocation7 + $0x22c] ss:$12 sps:$4 sm:$0xff]   ;;  %v1200_v11 = vld [vmem:[#allocation4 + $0x8] ss:$12 sps:$4 sm:$0xff]   ;;  %vm806_vm3 = vcmask 64512   ;;  %vm930_vm4 = vcmask 523264  }
  0x40   :  { %556 = vmatpush1.bf16.msra.mxu0 %v1145_v14  ;;  %1038 = vmatprep.subr.bf16.mxu1 %v1211_v39  ;;  %v1224_v12 = vld [vmem:[#allocation7 + $0x230] ss:$12 sps:$4 sm:$0xff]   ;;  %s1312_s2 = smov [#allocation9]  }
  0x41   :  { %557 = vmatprep.subr.bf16.mxu0 %v1146_v15  ;;  %s938_s9 = sshll.u32 %s1312_s2, 4  ;;  %s939_s9 = int_to_ptr.vmem [resolvable:$true] %s938_s9 }
  0x42   :  { %s1277_s10 = scalar_lea.vmem %s939_s9, 256  ;;  %p1282_p3 = scmp.lt.s32.totalorder %s939_s9, %s939_s9 }
  0x43   :  { %1039 = vmatpush3.bf16.msra.mxu1 %v1212_v42  ;;  %p1278_p2 = scmp.ne.s32.totalorder %s939_s9, %s1277_s10  ;;  %p1283_p4 = scmp.lt.s32.totalorder %s1277_s10, %s1277_s10 }
  0x44   :  { %558 = vmatpush1.bf16.msra.mxu0 %v1148_v16  ;;  %1040 = vmatprep.subr.bf16.mxu1 %v1213_v43 }
  0x45   :  { %559 = vmatprep.subr.bf16.mxu0 %v1149_v17  ;;  %p1284_p5 = por %p1283_p4, %p1282_p3 }
  0x47   :  { %1041 = vmatpush3.bf16.msra.mxu1 %v1214_v45  ;;  %p1285_p6 = pnand %p1284_p5, %p1278_p2 }
  0x48   :  { %560 = vmatpush1.bf16.msra.mxu0 %v1151_v18  ;;  %1042 = vmatprep.subr.bf16.mxu1 %v1215_v47 }
  0x49   :  { %561 = vmatprep.subr.bf16.mxu0 %v1152_v19 }
  0x4b   :  { %1043 = vmatpush3.bf16.msra.mxu1 %v1216_v50 }
  0x4c   :  { %562 = vmatpush1.bf16.msra.mxu0 %v1154_v20  ;;  %1067 = vmatprep.subr.bf16.mxu1 %v1310_v57 }
  0x4d   :  { %563 = vmatprep.subr.bf16.mxu0 %v1155_v21 }
  0x4e   :  { %662 = vmatmul.mubr.bf16.vlgmr.msra.gmra.mrb[0].mxu1 %v1173_v49 }
  0x4f   :  { %1068 = vmatpush3.bf16.msra.mxu1 %v1217_v53  ;;  %1083 = vmatprep.mubr.msk.bf16.mxu1 %vm1311_vm0, %v1310_v57 }
  0x50   :  { %564 = vmatpush1.bf16.msra.mxu0 %v1157_v24  ;;  %1069 = vmatprep.subr.bf16.mxu1 %v1310_v57 }
  0x51   :  { %565 = vmatprep.subr.bf16.mxu0 %v1158_v28 }
  0x53   :  { %1070 = vmatpush3.bf16.msra.mxu1 %v1218_v58 }
  0x54   :  { %566 = vmatpush1.bf16.msra.mxu0 %v1160_v29  ;;  %1071 = vmatprep.subr.bf16.mxu1 %v1310_v57 }
  0x55   :  { %567 = vmatprep.subr.bf16.mxu0 %v1161_v32 }
  0x57   :  { %1072 = vmatpush3.bf16.msra.mxu1 %v1219_v61 }
  0x58   :  { %568 = vmatpush1.bf16.msra.mxu0 %v1163_v33  ;;  %1073 = vmatprep.subr.bf16.mxu1 %v1310_v57 }
  0x59   :  { %569 = vmatprep.subr.bf16.mxu0 %v1164_v36 }
  0x5b   :  { %1074 = vmatpush3.bf16.msra.mxu1 %v1220_v0 }
  0x5c   :  { %570 = vmatpush1.bf16.msra.mxu0 %v1166_v37  ;;  %1075 = vmatprep.subr.bf16.mxu1 %v1310_v57  ;;  %v797_v37 = vlaneseq }
  0x5d   :  { %571 = vmatprep.subr.bf16.mxu0 %v1167_v40 }
  0x5e   :  { %v798_v38 = vshrl.u32 %v797_v37, 7  ;;  %v800_v39 = vand.u32 127, %v797_v37 }
  0x5f   :  { %1076 = vmatpush3.bf16.msra.mxu1 %v1221_v3 }
  0x60   :  { %572 = vmatpush1.bf16.msra.mxu0 %v1169_v41  ;;  %1077 = vmatprep.subr.bf16.mxu1 %v1310_v57  ;;  %vm801_vm2 = vcmp.le.s32.totalorder %v800_v39, %v798_v38 }
  0x61   :  { %573 = vmatprep.subr.bf16.mxu0 %v1170_v44 }
  0x63   :  { %1078 = vmatpush3.bf16.msra.mxu1 %v1222_v6 }
  0x64   :  { %574 = vmatpush1.bf16.msra.mxu0 %v1172_v46  ;;  %1079 = vmatprep.subr.bf16.mxu1 %v1310_v57 }
  0x65   :  { %586 = vmatprep.subr.bf16.mxu0 %v1178_v48 }
  0x67   :  { %576 = vmatmul.mubr.bf16.vlgmr.msra.gmra.mrb[0].mxu0 %v1173_v49  ;;  %1080 = vmatpush3.bf16.msra.mxu1 %v1223_v9 }
  0x68   :  { %587 = vmatpush1.bf16.msra.mxu0 %v1176_v51  ;;  %618 = vmatprep.mubr.bf16.mxu0 %v1309_v55 }
  0x69   :  { %588 = vmatprep.subr.bf16.mxu0 %v1181_v52  ;;  %1081 = vmatprep.subr.bf16.mxu1 %v1310_v57 }
  0x6b   :  { %1082 = vmatpush3.bf16.msra.mxu1 %v1224_v12 }
  0x6c   :  { %589 = vmatpush1.bf16.msra.mxu0 %v1179_v54  ;;  %1087 = vmatprep.subr.bf16.mxu1 %v1310_v57 }
  0x6d   :  { %590 = vmatprep.subr.bf16.mxu0 %v1184_v56 }
  0x6e   :  { %1084 = vmatmul.mubr.bf16.vlgmr.msra.gmra.mrb[4].mxu1 %v1200_v11 }
  0x6f   :  { %1089 = vmatprep.mubr.msk.bf16.mxu1 %vm1311_vm0, %v1310_v57 }
  0x70   :  { %591 = vmatpush1.bf16.msra.mxu0 %v1182_v59 }
  0x71   :  { %592 = vmatprep.subr.bf16.mxu0 %v1187_v60 }
  0x74   :  { %593 = vmatpush1.bf16.msra.mxu0 %v1185_v62 }
  0x75   :  { %594 = vmatprep.subr.bf16.mxu0 %v1190_v63 }
  0x78   :  { %595 = vmatpush1.bf16.msra.mxu0 %v1188_v1 }
  0x79   :  { %596 = vmatprep.subr.bf16.mxu0 %v1193_v2 }
  0x7c   :  { %597 = vmatpush1.bf16.msra.mxu0 %v1191_v4 }
  0x7d   :  { %598 = vmatprep.subr.bf16.mxu0 %v1196_v5 }
  0x80   :  { %599 = vmatpush1.bf16.msra.mxu0 %v1194_v7 }
  0x81   :  { %600 = vmatprep.subr.bf16.mxu0 %v1199_v8 }
  0x84   :  { %601 = vmatpush1.bf16.msra.mxu0 %v1197_v10 }
  0x87   :  { %619 = vmatmul.mubr.bf16.vlgmr.msra.gmra.mrb[0].mxu0 %v1200_v11 }
 0x121   :  { %v1044_v13 = vpop.f32.mrb[0].mxu1 }
 0x122   :  { %v1045_v14 = vpop.f32.mrb[1].mxu1 }
 0x123   :  { %v1046_v15 = vadd.f32 %v1045_v14, %v1044_v13  ;;  %v1047_v16 = vpop.f32.mrb[2].mxu1 }
 0x124   :  { %v1048_v17 = vpop.f32.mrb[3].mxu1 }
 0x125   :  { %v1049_v18 = vadd.f32 %v1048_v17, %v1047_v16 }
 0x141   :  { %v704_v24 = vpop.f32.mrb[4].mxu1 }
 0x142   :  { %v705_v25 = vadd.f32 %v1046_v15, %v704_v24  ;;  %v1085_v26 = vpop.f32.mrb[5].mxu1 }
 0x143   :  { %v707_v27 = vpop.f32.mrb[6].mxu1 }
 0x144   :  { %v708_v28 = vadd.f32 %v1049_v18, %v707_v27  ;;  %v1086_v29 = vpop.f32.mrb[7].mxu1  ;;  %v715_v34 = vpack.c.bf16 %v705_v25, %v705_v25 }
 0x146   :  { %v716_v30 = vpack.c.bf16 %v708_v28, %v708_v28  ;;  %v842_v36 = vsel %vm840_vm1, %v715_v34, 0 }
 0x148   :  { %v888_v33 = vsel %vm840_vm1, %v716_v30, 0 }
 0x15a   :  { %v620_v19 = vpop.f32.mrb[0].mxu0 }
 0x15b   :  { %v622_v20 = vpop.f32.mrb[1].mxu0  ;;  %v711_v31 = vpack.c.bf16 %v620_v19, %v620_v19 }
 0x15c   :  { %v713_v21 = vpack.c.bf16 %v622_v20, %v622_v20  ;;  %v624_v22 = vpop.f32.mrb[2].mxu0 }
 0x15d   :  { %v626_v23 = vpop.f32.mrb[3].mxu0  ;;  %v712_v35 = vpack.c.bf16 %v624_v22, %v624_v22 }
 0x15e   :  { %1088 = vmatpush3.bf16.xpose.msra.mxu1 %v713_v21  ;;  %v714_v32 = vpack.c.bf16 %v626_v23, %v626_v23 }
 0x15f   :  { %1093 = vmatprep.subr.bf16.mxu1 %v1310_v57 }
 0x165   :  { %1090 = vmatmul.mubr.bf16.vlgmr.msra.gmra.mrb[8].mxu1 %v711_v31 }
 0x166   :  { %1094 = vmatpush3.bf16.xpose.msra.mxu1 %v714_v32  ;;  %1095 = vmatprep.mubr.msk.bf16.mxu1 %vm1311_vm0, %v1310_v57 }
 0x167   :  { %1099 = vmatprep.subr.bf16.mxu1 %v1310_v57 }
 0x16d   :  { %1096 = vmatmul.mubr.bf16.vlgmr.msra.gmra.mrb[12].mxu1 %v712_v35 }
 0x16e   :  { %1100 = vmatpush3.bf16.msra.mxu1 %v842_v36  ;;  %1101 = vmatprep.mubr.msk.bf16.mxu1 %vm1311_vm0, %v1310_v57 }
 0x16f   :  { %1105 = vmatprep.subr.bf16.mxu1 %v1310_v57 }
 0x238   :  { %v751_v40 = vpop.f32.mrb[8].mxu1 }
 0x239   :  { %v804_v41 = vsel %vm801_vm2, %v751_v40, -inf  ;;  %v1091_v42 = vpop.f32.mrb[9].mxu1 }
 0x23a   :  { %v754_v43 = vpop.f32.mrb[10].mxu1  ;;  %v807_v44 = vsel %vm806_vm3, %v804_v41, -inf }
 0x23b   :  { %808 = vmax.xlane.f32.xlu0 %v807_v44  ;;  %v1092_v45 = vpop.f32.mrb[11].mxu1 }
 0x240   :  { %v791_v46 = vpop.f32.mrb[12].mxu1 }
 0x241   :  { %v805_v47 = vsel %vm801_vm2, %v791_v46, -inf  ;;  %v1097_v48 = vpop.f32.mrb[13].mxu1 }
 0x242   :  { %v794_v49 = vpop.f32.mrb[14].mxu1  ;;  %v810_v50 = vsel %vm806_vm3, %v805_v47, -inf }
 0x243   :  { %811 = vmax.xlane.f32.xlu0 %v810_v50  ;;  %v1098_v51 = vpop.f32.mrb[15].mxu1 }
 0x2c8   :  { %v809_v52 = vpop.xlane.xlu0 %808 }
 0x2c9   :  { %v813_v53 = vsub.f32 %v804_v41, %v809_v52 }
 0x2cb   :  { %v815_v54 = vpack.c.bf16 %v813_v53, %v813_v53 }
 0x2cd   :  { %v818_v55 = vmul.bf16 1069105081, %v815_v54 }
 0x2cf   :  { %1225 = vpow.bf16 %v818_v55 }
 0x2d0   :  { %v812_v56 = vpop.xlane.xlu0 %811 }
 0x2d1   :  { %v814_v58 = vsub.f32 %v805_v47, %v812_v56 }
 0x2d3   :  { %v816_v59 = vpack.c.bf16 %v814_v58, %v814_v58 }
 0x2d5   :  { %v821_v60 = vmul.bf16 1069105081, %v816_v59 }
 0x2d7   :  { %1227 = vpow.bf16 %v821_v60 }
 0x2da   :  { %v1226_v61 = vpop.eup %1225 }
 0x2db   :  { %v823_v62 = vunpack.c.l.bf16 %v1226_v61 }
 0x2dd   :  { %v825_v63 = vsel %vm806_vm3, %v823_v62, 0.0 }
 0x2de   :  { %826 = vadd.xlane.f32.xlu1 %v825_v63 }
 0x2e2   :  { %v1228_v0 = vpop.eup %1227 }
 0x2e3   :  { %v824_v1 = vunpack.c.l.bf16 %v1228_v0 }
 0x2e5   :  { %v828_v2 = vsel %vm806_vm3, %v824_v1, 0.0 }
 0x2e6   :  { %829 = vadd.xlane.f32.xlu1 %v828_v2 }
 0x36b   :  { %v827_v3 = vpop.xlane.xlu1 %826 }
 0x36c   :  { %1229 = vrcp.f32 %v827_v3 }
 0x373   :  { %v830_v4 = vpop.xlane.xlu1 %829 }
 0x374   :  { %1231 = vrcp.f32 %v830_v4 }
 0x376   :  { %v1230_v5 = vpop.eup %1229 }
 0x377   :  { %v833_v6 = vmul.f32 %v1230_v5, %v823_v62 }
 0x379   :  { %v835_v7 = vpack.c.bf16 %v833_v6, %v833_v6 }
 0x37b   :  { %1102 = vmatmul.mubr.msk.bf16.vlgmr.msra.gmra.mrb[16].mxu1 %vm806_vm3, %v835_v7 }
 0x37c   :  { %1106 = vmatpush3.bf16.msra.mxu1 %v888_v33  ;;  %1107 = vmatprep.mubr.msk.bf16.mxu1 %vm1311_vm0, %v1310_v57 }
 0x37e   :  { %v1232_v8 = vpop.eup %1231 }
 0x37f   :  { %v834_v9 = vmul.f32 %v1232_v8, %v824_v1 }
 0x381   :  { %v836_v10 = vpack.c.bf16 %v834_v9, %v834_v9 }
 0x383   :  { %1108 = vmatmul.mubr.msk.bf16.vlgmr.msra.gmra.mrb[20].mxu1 %vm806_vm3, %v836_v10 }
 0x44e   :  { %v878_v11 = vpop.f32.mrb[16].mxu1 }
 0x44f   :  { %931 = vst.msk [vmem:[#allocation9] sm:$0xff] %vm930_vm4, %v878_v11  ;;  %v1103_v12 = vpop.f32.mrb[17].mxu1 }
 0x450   :  { %v881_v13 = vpop.f32.mrb[18].mxu1 }
 0x451   :  { %v1104_v14 = vpop.f32.mrb[19].mxu1 }
 0x456   :  { %v924_v15 = vpop.f32.mrb[20].mxu1 }
 0x457   :  { %932 = vst.msk [vmem:[#allocation9 + $0x8] sm:$0xff] %vm930_vm4, %v924_v15  ;;  %v1109_v16 = vpop.f32.mrb[21].mxu1 }
 0x458   :  { %v927_v17 = vpop.f32.mrb[22].mxu1 }
 0x459   :  { %1288 = shalt.err (!%p1285_p6)
}
 0x45a   :  { %s1289_s13 = scalar_lea.hbm %s1402_s3, 256 }
 0x45b   :  { %p1290_p7 = scmp.ne.s32.totalorder %s1402_s3, %s1289_s13  ;;  %p1293_p8 = scmp.lt.u32.totalorder %s1289_s13, %s1402_s3 }
 0x45d   :  { %p1295_p9 = pnand %p1293_p8, %p1290_p7 }
 0x45f   :  { %1298 = shalt.err (!%p1295_p9)
}
 0x460   :  { %s1313_s17 = smov 128   ;;  %s1314_s18 = smov 8   ;;  %v1110_v57 = vpop.f32.mrb[23].mxu1 }
 0x461   :  { %944 = dma.vmem_to_hbm [thread:$0]  %s939_s9, 256, %s1402_s3, [#allocation6], %s1313_s17, %s1313_s17, %s1314_s18  }
 0x462   :  { %1303 = dma.done.wait [#allocation6], 256  }
 0x463   :  { %1304 = vsyncadd [#allocation6], 4294967040 }
 0x464   :  { %948 = vsyncpa [#allocation5], 1 }
 0x465   :  { %949 = vsyncpa [#allocation8], 1 }
 0x466   :  { %950 = vsyncpa [#allocation6], 1 }

</bundles_post_ra>
